<compile_context>
chip_gen: v6e
topology: v6e:2x2x1
jax: 0.10.0
libtpu: 0.0.40
codegen_flags: <defaults>
</compile_context>

<pallas_src>
import math
import functools

import jax
import jax.numpy as jnp
from jax.experimental import pallas as pl
from jax.experimental.pallas import tpu as pltpu


# ----------------------------------------------------------------------------
# Helpers
# ----------------------------------------------------------------------------
def _softplus(x):
    """Numerically stable softplus, matching F.softplus(threshold=20)."""
    return jnp.where(x > 20.0, x, jnp.log1p(jnp.exp(jnp.minimum(x, 20.0))))


def _fit_tile(tile, dim, quantum):
    """Clamp tile to dim; fall back to the full extent when the tile would
    violate divisibility or the (8,128) layout rule (full-extent blocks are
    always legal)."""
    tile = min(int(tile), int(dim))
    if dim % tile != 0 or (tile % quantum != 0 and tile != dim):
        tile = int(dim)
    return tile


def _default_tiles():
    """Generation-aware tile budget. v5e/v6e: 128 MiB physical VMEM;
    v7x: 64 MiB (and 2 TensorCores -> rely on the parallel grid axes)."""
    try:
        vmem = pltpu.get_tpu_info().vmem_capacity_bytes
    except Exception:  # interpret mode / API drift: assume the smaller budget
        vmem = 64 << 20
    if vmem >= (96 << 20):
        return 256, 1024, 512   # v5e / v6e
    return 256, 512, 512        # v7x


def _vmem_limit_bytes(tm, tn, tk, n_weight_like, n_bias_like):
    """Raise the scoped-VMEM limit only when the double-buffered pipeline needs
    more than the 32 MiB default; stay under v7x's 64 MiB physical VMEM."""
    per_step = 4 * (tm * tk + n_weight_like * tk * tn + n_bias_like * tn + tm * tn)
    est = 2 * per_step + 4 * tm * tn           # 2x pipeline buffers + f32 acc
    est = int(est * 1.25) + (2 << 20)          # headroom
    if est <= (32 << 20):
        return None                            # default scoped limit suffices
    return min(est, 56 << 20)


# ----------------------------------------------------------------------------
# Kernels
# ----------------------------------------------------------------------------
def _sampled_linear_kernel(x_ref, wm_ref, wsp_ref, weps_ref,
                           bm_ref, bsp_ref, beps_ref, o_ref, acc_ref,
                           *, use_bf16):
    """variance=True: reparameterized weight/bias sample + tiled matmul."""
    k = pl.program_id(2)

    @pl.when(k == 0)
    def _init():
        acc_ref[...] = jnp.zeros_like(acc_ref)

    # Sample the weight tile (already (tk, tn) = (in, out) layout -> no transpose).
    w = wm_ref[...] + _softplus(wsp_ref[...]) * weps_ref[...]
    x = x_ref[...]
    if use_bf16:
        x = x.astype(jnp.bfloat16)
        w = w.astype(jnp.bfloat16)
    acc_ref[...] += jnp.dot(x, w, preferred_element_type=jnp.float32)

    @pl.when(k == pl.num_programs(2) - 1)
    def _finalize():
        bias = bm_ref[...] + _softplus(bsp_ref[...]) * beps_ref[...]   # (1, tn)
        o_ref[...] = (acc_ref[...] + bias).astype(o_ref.dtype)


def _mean_linear_kernel(x_ref, wm_ref, bm_ref, o_ref, acc_ref, *, use_bf16):
    """variance=False: deterministic mean forward (no std/eps traffic)."""
    k = pl.program_id(2)

    @pl.when(k == 0)
    def _init():
        acc_ref[...] = jnp.zeros_like(acc_ref)

    x = x_ref[...]
    w = wm_ref[...]
    if use_bf16:
        x = x.astype(jnp.bfloat16)
        w = w.astype(jnp.bfloat16)
    acc_ref[...] += jnp.dot(x, w, preferred_element_type=jnp.float32)

    @pl.when(k == pl.num_programs(2) - 1)
    def _finalize():
        o_ref[...] = (acc_ref[...] + bm_ref[...]).astype(o_ref.dtype)


# ----------------------------------------------------------------------------
# Wrapper
# ----------------------------------------------------------------------------
@functools.partial(jax.jit,
                   static_argnames=("variance", "use_bf16", "tm", "tn", "tk"))
def ext_emp_bayes_linear(x, weight_mean, weight_std_param,
                         bias_mean, bias_std_param,
                         eps_w=None, eps_b=None, *,
                         variance=True, use_bf16=False,
                         tm=None, tn=None, tk=None):
    """Forward pass of ExtEmpBayesLinear.

    x:                 (B, in_features) float32
    weight_mean/std:   (out_features, in_features)   [PyTorch layout]
    bias_mean/std:     (out_features,)
    eps_w / eps_b:     reparameterization noise (required when variance=True)
    """
    B, in_f = x.shape
    out_f = weight_mean.shape[0]

    dtm, dtn, dtk = _default_tiles()
    tm = _fit_tile(tm if tm is not None else dtm, B, 8)
    tn = _fit_tile(tn if tn is not None else dtn, out_f, 128)
    tk = _fit_tile(tk if tk is not None else dtk, in_f, 128)
    grid = (B // tm, out_f // tn, in_f // tk)

    # (out, in) -> (in, out): MXU consumes the sampled weight tile directly.
    wm_t = weight_mean.T
    bm2 = bias_mean.reshape(1, out_f)

    x_spec = pl.BlockSpec((tm, tk), lambda i, j, k: (i, k))
    w_spec = pl.BlockSpec((tk, tn), lambda i, j, k: (k, j))
    b_spec = pl.BlockSpec((1, tn), lambda i, j, k: (0, j))
    o_spec = pl.BlockSpec((tm, tn), lambda i, j, k: (i, j))

    if variance:
        if eps_w is None or eps_b is None:
            raise ValueError("variance=True requires eps_w and eps_b")
        # TODO(synk): generate eps_w in-kernel (pltpu.prng_seed +
        # pltpu.stateful_normal seeded per (j,k) weight tile) to cut weight-path
        # HBM traffic by ~1/3; kept as explicit inputs here so the forward is
        # exactly reproducible against the pure-JAX/PyTorch reference.
        wsp_t = weight_std_param.T
        weps_t = eps_w.T
        bsp2 = bias_std_param.reshape(1, out_f)
        beps2 = eps_b.reshape(1, out_f)
        kernel = functools.partial(_sampled_linear_kernel, use_bf16=use_bf16)
        in_specs = [x_spec, w_spec, w_spec, w_spec, b_spec, b_spec, b_spec]
        operands = (x, wm_t, wsp_t, weps_t, bm2, bsp2, beps2)
        n_w, n_b = 3, 3
    else:
        kernel = functools.partial(_mean_linear_kernel, use_bf16=use_bf16)
        in_specs = [x_spec, w_spec, b_spec]
        operands = (x, wm_t, bm2)
        n_w, n_b = 1, 1

    # TODO(synk): bias=False variant (no bias_mean/_bias_std_param) not wired up.
    # TODO(synk): prior_* parameters only enter the (external) KL term, not forward.

    return pl.pallas_call(
        kernel,
        out_shape=jax.ShapeDtypeStruct((B, out_f), x.dtype),
        grid_spec=pltpu.PrefetchScalarGridSpec(
            num_scalar_prefetch=0,
            grid=grid,
            in_specs=in_specs,
            out_specs=o_spec,
            scratch_shapes=[pltpu.VMEM((tm, tn), jnp.float32)],
        ),
        compiler_params=pltpu.CompilerParams(
            dimension_semantics=("parallel", "parallel", "arbitrary"),
            vmem_limit_bytes=_vmem_limit_bytes(tm, tn, tk, n_w, n_b),
        ),
    )(*operands)


# ----------------------------------------------------------------------------
# Pure-JAX reference
# ----------------------------------------------------------------------------
def _reference(x, wm, wsp, bm, bsp, eps_w, eps_b, variance=True):
    if variance:
        w = wm + _softplus(wsp) * eps_w
        b = bm + _softplus(bsp) * eps_b
    else:
        w, b = wm, bm
    y = jax.lax.dot_general(x, w, (((1,), (1,)), ((), ())),
                            preferred_element_type=jnp.float32)
    return y + b[None, :]


# ----------------------------------------------------------------------------
# Self-test
# ----------------------------------------------------------------------------
if __name__ == "__main__":
    key = jax.random.PRNGKey(0)
    k_x, k_wm, k_bm, k_ew, k_eb = jax.random.split(key, 5)

    B, in_features, out_features = 16, 256, 384
    init_std = 0.05
    bound = 1.0 / math.sqrt(in_features)
    std_init = math.log(math.exp(init_std) - 1.0)   # softplus^{-1}(init_std)

    # Parameter init mirroring reset_parameters()
    x = jax.random.normal(k_x, (B, in_features), dtype=jnp.float32)
    weight_mean = jax.random.uniform(k_wm, (out_features, in_features),
                                     minval=-bound, maxval=bound,
                                     dtype=jnp.float32)
    weight_std_param = jnp.full((out_features, in_features), std_init,
                                dtype=jnp.float32)
    bias_mean = jax.random.uniform(k_bm, (out_features,), minval=-bound,
                                   maxval=bound, dtype=jnp.float32)
    bias_std_param = jnp.full((out_features,), std_init, dtype=jnp.float32)

    # Reparameterization noise (the torch.randn_like draws), fixed by PRNGKey(0)
    eps_w = jax.random.normal(k_ew, (out_features, in_features),
                              dtype=jnp.float32)
    eps_b = jax.random.normal(k_eb, (out_features,), dtype=jnp.float32)

    args = (x, weight_mean, weight_std_param, bias_mean, bias_std_param,
            eps_w, eps_b)

    # 1) Sampled (variance=True) path, explicit small tiles -> grid (2, 3, 2)
    out = jax.block_until_ready(
        ext_emp_bayes_linear(*args, variance=True, tm=8, tn=128, tk=128))
    ref = _reference(*args, variance=True)
    assert out.shape == (B, out_features)
    assert bool(jnp.allclose(out, ref, atol=1e-3, rtol=1e-3)), (
        f"sampled path max abs err {float(jnp.max(jnp.abs(out - ref)))}")

    # 2) Deterministic (variance=False) dedicated kernel — no std/eps traffic
    out_det = jax.block_until_ready(
        ext_emp_bayes_linear(x, weight_mean, weight_std_param,
                             bias_mean, bias_std_param,
                             variance=False, tm=8, tn=128, tk=128))
    ref_det = _reference(*args, variance=False)
    assert bool(jnp.allclose(out_det, ref_det, atol=1e-3, rtol=1e-3)), (
        f"mean path max abs err {float(jnp.max(jnp.abs(out_det - ref_det)))}")

    # 3) Generation-aware default tiles (problem fits in one block here)
    out_d = jax.block_until_ready(ext_emp_bayes_linear(*args, variance=True))
    assert bool(jnp.allclose(out_d, ref, atol=1e-3, rtol=1e-3))

    # 4) bf16 MXU path for the compute-bound regime (looser tolerance vs f32 ref)
    out_bf16 = jax.block_until_ready(
        ext_emp_bayes_linear(*args, variance=True, use_bf16=True,
                             tm=8, tn=128, tk=128))
    assert bool(jnp.allclose(out_bf16, ref, atol=5e-2, rtol=5e-2))

    print("KERNEL_OK")
</pallas_src>

<mosaic_0001>
module attributes {stable_mosaic.version = 11 : i64} {
  func.func @_sampled_linear_kernel(%arg0: i32, %arg1: i32, %arg2: i32, %arg3: memref<8x128xf32, #tpu.memory_space<vmem>>, %arg4: memref<128x128xf32, #tpu.memory_space<vmem>>, %arg5: memref<128x128xf32, #tpu.memory_space<vmem>>, %arg6: memref<128x128xf32, #tpu.memory_space<vmem>>, %arg7: memref<1x128xf32, #tpu.memory_space<vmem>>, %arg8: memref<1x128xf32, #tpu.memory_space<vmem>>, %arg9: memref<1x128xf32, #tpu.memory_space<vmem>>, %arg10: memref<8x128xf32, #tpu.memory_space<vmem>>, %arg11: memref<8x128xf32, #tpu.memory_space<vmem>>) attributes {dimension_semantics = [#tpu.dimension_semantics<parallel>, #tpu.dimension_semantics<parallel>, #tpu.dimension_semantics<arbitrary>], iteration_bounds = array<i64: 2, 3, 2>, scalar_prefetch = 0 : i64, scratch_operands = 1 : i64, tpu.core_type = #tpu.core_type<tc>, window_params = [{transform_indices = @transform_0, window_bounds = array<i64: 8, 128>}, {transform_indices = @transform_1, window_bounds = array<i64: 128, 128>}, {transform_indices = @transform_2, window_bounds = array<i64: 128, 128>}, {transform_indices = @transform_3, window_bounds = array<i64: 128, 128>}, {transform_indices = @transform_4, window_bounds = array<i64: 1, 128>}, {transform_indices = @transform_5, window_bounds = array<i64: 1, 128>}, {transform_indices = @transform_6, window_bounds = array<i64: 1, 128>}, {transform_indices = @transform_7, window_bounds = array<i64: 8, 128>}]} {
    %c0_i32 = arith.constant 0 : i32
    %0 = arith.cmpi eq, %arg2, %c0_i32 : i32
    %1 = arith.extui %0 : i1 to i32
    %c0_i32_0 = arith.constant 0 : i32
    %2 = arith.cmpi ne, %1, %c0_i32_0 : i32
    scf.if %2 {
      %cst_15 = arith.constant 0.000000e+00 : f32
      %23 = vector.broadcast %cst_15 : f32 to vector<8x128xf32>
      %c0_16 = arith.constant 0 : index
      %c0_17 = arith.constant 0 : index
      %24 = vector.load %arg11[%c0_16, %c0_17] : memref<8x128xf32, #tpu.memory_space<vmem>>, vector<8x128xf32>
      tpu.vector_store %arg11[%c0_16, %c0_17], %23 {strides = array<i32>} : memref<8x128xf32, #tpu.memory_space<vmem>>, vector<8x128xf32>,
    } else {
    }
    %c0 = arith.constant 0 : index
    %c0_1 = arith.constant 0 : index
    %3 = vector.load %arg4[%c0, %c0_1] : memref<128x128xf32, #tpu.memory_space<vmem>>, vector<128x128xf32>
    %c0_2 = arith.constant 0 : index
    %c0_3 = arith.constant 0 : index
    %4 = vector.load %arg5[%c0_2, %c0_3] : memref<128x128xf32, #tpu.memory_space<vmem>>, vector<128x128xf32>
    %cst = arith.constant 2.000000e+01 : f32
    %5 = vector.broadcast %cst : f32 to vector<128x128xf32>
    %6 = arith.cmpf ogt, %4, %5 : vector<128x128xf32>
    %cst_4 = arith.constant 2.000000e+01 : f32
    %7 = vector.broadcast %cst_4 : f32 to vector<128x128xf32>
    %8 = arith.minimumf %4, %7 : vector<128x128xf32>
    %9 = math.exp %8 : vector<128x128xf32>
    %10 = math.log1p %9 : vector<128x128xf32>
    %11 = arith.select %6, %4, %10 : vector<128x128xi1>, vector<128x128xf32>
    %c0_5 = arith.constant 0 : index
    %c0_6 = arith.constant 0 : index
    %12 = vector.load %arg6[%c0_5, %c0_6] : memref<128x128xf32, #tpu.memory_space<vmem>>, vector<128x128xf32>
    %13 = arith.mulf %11, %12 : vector<128x128xf32>
    %14 = arith.addf %3, %13 : vector<128x128xf32>
    %c0_7 = arith.constant 0 : index
    %c0_8 = arith.constant 0 : index
    %15 = vector.load %arg3[%c0_7, %c0_8] : memref<8x128xf32, #tpu.memory_space<vmem>>, vector<8x128xf32>
    %c0_9 = arith.constant 0 : index
    %c0_10 = arith.constant 0 : index
    %16 = vector.load %arg11[%c0_9, %c0_10] : memref<8x128xf32, #tpu.memory_space<vmem>>, vector<8x128xf32>
    %cst_11 = arith.constant dense<0.000000e+00> : vector<8x128xf32>
    %17 = tpu.matmul %15, %14, %cst_11 {dimension_numbers = #tpu.dot_dimension_numbers<[1], [0], [0], [1], [0, 0, 1, 1], [], []>} : vector<8x128xf32>, vector<128x128xf32>, vector<8x128xf32> -> vector<8x128xf32>
    %18 = arith.addf %16, %17 : vector<8x128xf32>
    %c0_12 = arith.constant 0 : index
    %c0_13 = arith.constant 0 : index
    %19 = vector.load %arg11[%c0_12, %c0_13] : memref<8x128xf32, #tpu.memory_space<vmem>>, vector<8x128xf32>
    tpu.vector_store %arg11[%c0_12, %c0_13], %18 {strides = array<i32>} : memref<8x128xf32, #tpu.memory_space<vmem>>, vector<8x128xf32>,
    %c1_i32 = arith.constant 1 : i32
    %20 = arith.cmpi eq, %arg2, %c1_i32 : i32
    %21 = arith.extui %20 : i1 to i32
    %c0_i32_14 = arith.constant 0 : i32
    %22 = arith.cmpi ne, %21, %c0_i32_14 : i32
    scf.if %22 {
      %c0_15 = arith.constant 0 : index
      %c0_16 = arith.constant 0 : index
      %23 = vector.load %arg7[%c0_15, %c0_16] : memref<1x128xf32, #tpu.memory_space<vmem>>, vector<1x128xf32>
      %c0_17 = arith.constant 0 : index
      %c0_18 = arith.constant 0 : index
      %24 = vector.load %arg8[%c0_17, %c0_18] : memref<1x128xf32, #tpu.memory_space<vmem>>, vector<1x128xf32>
      %cst_19 = arith.constant 2.000000e+01 : f32
      %25 = vector.broadcast %cst_19 : f32 to vector<1x128xf32>
      %26 = arith.cmpf ogt, %24, %25 : vector<1x128xf32>
      %cst_20 = arith.constant 2.000000e+01 : f32
      %27 = vector.broadcast %cst_20 : f32 to vector<1x128xf32>
      %28 = arith.minimumf %24, %27 : vector<1x128xf32>
      %29 = math.exp %28 : vector<1x128xf32>
      %30 = math.log1p %29 : vector<1x128xf32>
      %31 = arith.select %26, %24, %30 : vector<1x128xi1>, vector<1x128xf32>
      %c0_21 = arith.constant 0 : index
      %c0_22 = arith.constant 0 : index
      %32 = vector.load %arg9[%c0_21, %c0_22] : memref<1x128xf32, #tpu.memory_space<vmem>>, vector<1x128xf32>
      %33 = arith.mulf %31, %32 : vector<1x128xf32>
      %34 = arith.addf %23, %33 : vector<1x128xf32>
      %c0_23 = arith.constant 0 : index
      %c0_24 = arith.constant 0 : index
      %35 = vector.load %arg11[%c0_23, %c0_24] : memref<8x128xf32, #tpu.memory_space<vmem>>, vector<8x128xf32>
      %36 = vector.broadcast %34 : vector<1x128xf32> to vector<8x128xf32>
      %37 = arith.addf %35, %36 : vector<8x128xf32>
      %c0_25 = arith.constant 0 : index
      %c0_26 = arith.constant 0 : index
      %38 = vector.load %arg10[%c0_25, %c0_26] : memref<8x128xf32, #tpu.memory_space<vmem>>, vector<8x128xf32>
      tpu.vector_store %arg10[%c0_25, %c0_26], %37 {strides = array<i32>} : memref<8x128xf32, #tpu.memory_space<vmem>>, vector<8x128xf32>,
    } else {
    }
    return
  }
  func.func @transform_0(%arg0: i32, %arg1: i32, %arg2: i32) -> (i32, i32) {
    %c0_i32 = arith.constant 0 : i32
    return %arg0, %arg2 : i32, i32
  }
  func.func @transform_1(%arg0: i32, %arg1: i32, %arg2: i32) -> (i32, i32) {
    %c0_i32 = arith.constant 0 : i32
    return %arg2, %arg1 : i32, i32
  }
  func.func @transform_2(%arg0: i32, %arg1: i32, %arg2: i32) -> (i32, i32) {
    %c0_i32 = arith.constant 0 : i32
    return %arg2, %arg1 : i32, i32
  }
  func.func @transform_3(%arg0: i32, %arg1: i32, %arg2: i32) -> (i32, i32) {
    %c0_i32 = arith.constant 0 : i32
    return %arg2, %arg1 : i32, i32
  }
  func.func @transform_4(%arg0: i32, %arg1: i32, %arg2: i32) -> (i32, i32) {
    %c0_i32 = arith.constant 0 : i32
    %c0_i32_0 = arith.constant 0 : i32
    return %c0_i32, %arg1 : i32, i32
  }
  func.func @transform_5(%arg0: i32, %arg1: i32, %arg2: i32) -> (i32, i32) {
    %c0_i32 = arith.constant 0 : i32
    %c0_i32_0 = arith.constant 0 : i32
    return %c0_i32, %arg1 : i32, i32
  }
  func.func @transform_6(%arg0: i32, %arg1: i32, %arg2: i32) -> (i32, i32) {
    %c0_i32 = arith.constant 0 : i32
    %c0_i32_0 = arith.constant 0 : i32
    return %c0_i32, %arg1 : i32, i32
  }
  func.func @transform_7(%arg0: i32, %arg1: i32, %arg2: i32) -> (i32, i32) {
    %c0_i32 = arith.constant 0 : i32
    return %arg0, %arg1 : i32, i32
  }
}

</mosaic_0001>

<bundles_post_ra>
// kernel: ext_emp_bayes_linear.1
= control target key start
LH: loop header
LB: loop body
LE: loop exit
PB: predicated region body
PF: predicated region fallthrough
CT: control target
= control target key end

     0   :  { %s2349_s0 = inlined_call_operand.vmem [shape: f32[16,256], index: 0, kind: input, shape index: {}]   ;;  %s2350_s1 = inlined_call_operand.vmem [shape: f32[256,384], index: 1, kind: input, shape index: {}]   ;;  %s2351_s2 = inlined_call_operand.vmem [shape: f32[256,384], index: 2, kind: input, shape index: {}]   ;;  %s2352_s3 = inlined_call_operand.vmem [shape: f32[256,384], index: 3, kind: input, shape index: {}]   ;;  %s2353_s4 = inlined_call_operand.vmem [shape: f32[1,384], index: 4, kind: input, shape index: {}]   ;;  %s2354_s5 = inlined_call_operand.vmem [shape: f32[1,384], index: 5, kind: input, shape index: {}]   ;;  %s2355_s6 = inlined_call_operand.vmem [shape: f32[1,384], index: 6, kind: input, shape index: {}]   ;;  %s2356_s7 = inlined_call_operand.hbm [shape: f32[16,384], index: 7, kind: output, shape index: {}]  }
   0x1   :  { %2365 = sst [smem:[#allocation16_spill]] %s2349_s0 }
   0x2   :  { %2366 = sst [smem:[#allocation17_spill]] %s2350_s1 }
   0x3   :  { %2367 = sst [smem:[#allocation18_spill]] %s2351_s2 }
   0x4   :  { %2368 = sst [smem:[#allocation19_spill]] %s2352_s3 }
   0x5   :  { %2369 = sst [smem:[#allocation20_spill]] %s2354_s5 }
   0x6   :  { %2370 = sst [smem:[#allocation21_spill]] %s2355_s6 }
   0x7   :  { %2371 = sst [smem:[#allocation22_spill]] %s2356_s7 }
   0x8   :  { %12 = vsyncpa [#allocation7], 0 }
   0x9   :  { %14 = vsyncpa [#allocation7 + $0x1], 0  ;;  %s1745_s24 = smov 0   ;;  %s1747_s25 = smov 0  }
   0xa   :  { %s1749_s26 = smov 0   ;;  %s1751_s27 = smov 0  }
   0xb   :  { %s1753_s28 = smov 0   ;;  %s1755_s29 = smov 0  }
   0xc   :  { %s1757_s30 = smov 0   ;;  %s1759_s8 = smov 0  }
   0xd   :  { %s1761_s9 = smov 0   ;;  %s1763_s10 = smov 0  }
   0xe   :  { %s1765_s11 = smov 0   ;;  %s1767_s12 = smov 0  }
   0xf LB: > { %2372 = sst [smem:[#allocation9_spill]] %s1687_s9  ;;  %s1316_s13 = sadd.s32 4294967295, %s1699_s12   ;;  %s1699_s12 = sphi %s1767_s12, %s20_s12   ;;  %s1695_s11 = sphi %s1765_s11, %s2420_s11   ;;  %s1691_s10 = sphi %s1763_s10, %s2419_s10   ;;  %s1687_s9 = sphi %s1761_s9, %s2418_s9   ;;  %s1683_s8 = sphi %s1759_s8, %s2417_s8   ;;  %s1679_s30 = sphi %s1757_s30, %s2416_s30   ;;  %s1675_s29 = sphi %s1755_s29, %s2415_s29   ;;  %s1671_s28 = sphi %s1753_s28, %s2425_s28   ;;  %s1667_s27 = sphi %s1751_s27, %s2424_s27   ;;  %s1663_s26 = sphi %s1749_s26, %s2423_s26   ;;  %s1659_s25 = sphi %s1747_s25, %s2422_s25   ;;  %s1655_s24 = sphi %s1745_s24, %s2421_s24  }
  0x10   : > { %2373 = sst [smem:[#allocation10_spill]] %s1691_s10  ;;  %s1317_s14 = sadd.s32 4294967294, %s1699_s12  }
  0x11   : > { %2374 = sst [smem:[#allocation11_spill]] %s1695_s11  ;;  %s32_s15 = sadd.s32 1, %s1687_s9 }
  0x12   : > { %s35_s16 = sadd.s32 1, %s1691_s10  ;;  %p33_p0 = scmp.ge.s32.totalorder %s32_s15, 2 }
  0x13   : > { %s39_s17 = sadd.s32 1, %s1695_s11  ;;  %s76_s18 = sadd.s32 1, %s1671_s28 }
  0x14   : > { %p83_p1 = scmp.ne.s32.totalorder %s1671_s28, %s1667_s27  ;;  %s2427_s15 = smov (%p33_p0, %s32_s15), 0 }
  0x15   : > { %2375 = sst [smem:[#allocation12_spill]] %s2427_s15  ;;  %s2429_s16 = smov (!%p33_p0, %s35_s16), %s1691_s10 }
  0x16   : > { %s71_s19 = ssub.s32 %s1687_s9, %s2427_s15  ;;  %p84_p2 = scmp.eq.s32.totalorder %s1699_s12, 0 }
  0x17   : > { %p37_p3 = scmp.ge.s32.totalorder %s2429_s16, 3  ;;  %s238_s20 = sadd.s32 1, %s1663_s26 }
  0x18   : > { %p1820_p4 = por %p84_p2, %p83_p1  ;;  %p248_p5 = scmp.ne.s32.totalorder %s1663_s26, %s1659_s25 }
  0x19   : > { %s2431_s16 = smov (%p37_p3, %s2429_s16), 0  ;;  %s2433_s17 = smov (!%p37_p3, %s39_s17), %s1695_s11 }
  0x1a   : > { %2377 = sst [smem:[#allocation13_spill]] %s2431_s16  ;;  %s72_s22 = ssub.s32 %s1691_s10, %s2431_s16 }
  0x1b   : > { %p249_p6 = scmp.eq.s32.totalorder %s1316_s13, 11  ;;  %p41_p7 = scmp.ge.s32.totalorder %s2433_s17, 2 }
  0x1c   : > { %s73_s23 = sor.u32 %s72_s22, %s71_s19  ;;  %p254_p10 = scmp.ne.s32.totalorder %s1659_s25, %s1655_s24 }
  0x1d   : > { %p74_p8 = scmp.eq.s32.totalorder %s73_s23, 0  ;;  %p1831_p9 = por %p249_p6, %p248_p5 }
  0x1e   : > { %s2435_s17 = smov (%p41_p7, %s2433_s17), 0  ;;  %p255_p11 = scmp.eq.s32.totalorder %s1317_s14, 11 }
  0x1f   : > { %2379 = sst [smem:[#allocation14_spill]] %s2435_s17  ;;  %s233_s6 = ssub.s32 %s1695_s11, %s2435_s17 }
  0x20   : > { %s1838_s7 = scalar_select %p74_p8, %s1671_s28, %s76_s18  }
  0x21   : > { %s235_s5 = sor.u32 %s233_s6, %s72_s22  ;;  %p1844_p13 = por %p255_p11, %p254_p10 }
  0x22   : > { %2380 = sst [smem:[#allocation15_spill]] %s1838_s7  ;;  %p236_p12 = scmp.eq.s32.totalorder %s235_s5, 0 }
  0x23   : > { %p1319_p0 = scmp.ge.s32.totalorder %s1699_s12, 12 }
  0x24   : > { %s1849_s13 = scalar_select %p236_p12, %s1663_s26, %s238_s20  }
  0x25   : > { %271 = sbr.rel (%p1319_p0) target bundleno = 96 (0x60), region = 16 }
  0x2a   : > { %285 = sbr.rel (!%p1820_p4) target bundleno = 60 (0x3c), region = 24  ;;  %s287_s18 = sand.u32 (%p1820_p4), 1, %s1671_s28  }
  0x2b   : > { %s1397_s19 = smul.u32 (%p1820_p4), 48, %s1687_s9  ;;  %s1320_s6 = sshll.u32 (%p1820_p4), %s287_s18, 7 }
  0x2c   : > { %s2382_s1 = sld [smem:[#allocation17_spill]] (%p1820_p4)  ;;  %s289_s20 = scalar_lea.vmem (%p1820_p4), [#allocation3], %s1320_s6 }
  0x2d   : > { %s292_s14 = sadd.s32 (%p1820_p4), %s1691_s10, %s1397_s19 }
  0x2e   : > { %s1323_s5 = sshll.u32 (%p1820_p4), %s292_s14, 3 }
  0x32   : > { %s1860_s17 = scalar_lea.vmem %s2382_s1, %s1323_s5 }
  0x33   : > { %v353_v0 = vld [vmem:[%s1860_s17] sm:$0xff]  ;;  %v355_v1 = vld [vmem:[%s1860_s17 + $0x18] sm:$0xff]  ;;  %v357_v2 = vld [vmem:[%s1860_s17 + $0x30] sm:$0xff] }
  0x34   : > { %354 = vst [vmem:[%s289_s20] sm:$0xff] %v353_v0  ;;  %356 = vst [vmem:[%s289_s20 + $0x8] sm:$0xff] %v355_v1  ;;  %v359_v3 = vld [vmem:[%s1860_s17 + $0x48] sm:$0xff]  ;;  %v361_v4 = vld [vmem:[%s1860_s17 + $0x60] sm:$0xff] }
  0x35   : > { %358 = vst [vmem:[%s289_s20 + $0x10] sm:$0xff] %v357_v2  ;;  %v363_v5 = vld [vmem:[%s1860_s17 + $0x78] sm:$0xff]  ;;  %360 = vst [vmem:[%s289_s20 + $0x18] sm:$0xff] %v359_v3  ;;  %v365_v6 = vld [vmem:[%s1860_s17 + $0x90] sm:$0xff] }
  0x36   : > { %362 = vst [vmem:[%s289_s20 + $0x20] sm:$0xff] %v361_v4  ;;  %364 = vst [vmem:[%s289_s20 + $0x28] sm:$0xff] %v363_v5  ;;  %v367_v7 = vld [vmem:[%s1860_s17 + $0xa8] sm:$0xff]  ;;  %v369_v8 = vld [vmem:[%s1860_s17 + $0xc0] sm:$0xff] }
  0x37   : > { %366 = vst [vmem:[%s289_s20 + $0x30] sm:$0xff] %v365_v6  ;;  %368 = vst [vmem:[%s289_s20 + $0x38] sm:$0xff] %v367_v7  ;;  %v371_v9 = vld [vmem:[%s1860_s17 + $0xd8] sm:$0xff]  ;;  %v373_v10 = vld [vmem:[%s1860_s17 + $0xf0] sm:$0xff] }
  0x38   : > { %370 = vst [vmem:[%s289_s20 + $0x40] sm:$0xff] %v369_v8  ;;  %v375_v11 = vld [vmem:[%s1860_s17 + $0x108] sm:$0xff]  ;;  %372 = vst [vmem:[%s289_s20 + $0x48] sm:$0xff] %v371_v9  ;;  %v377_v12 = vld [vmem:[%s1860_s17 + $0x120] sm:$0xff] }
  0x39   : > { %374 = vst [vmem:[%s289_s20 + $0x50] sm:$0xff] %v373_v10  ;;  %376 = vst [vmem:[%s289_s20 + $0x58] sm:$0xff] %v375_v11  ;;  %v379_v13 = vld [vmem:[%s1860_s17 + $0x138] sm:$0xff]  ;;  %v381_v14 = vld [vmem:[%s1860_s17 + $0x150] sm:$0xff] }
  0x3a   : > { %378 = vst [vmem:[%s289_s20 + $0x60] sm:$0xff] %v377_v12  ;;  %380 = vst [vmem:[%s289_s20 + $0x68] sm:$0xff] %v379_v13  ;;  %v383_v15 = vld [vmem:[%s1860_s17 + $0x168] sm:$0xff] }
  0x3b   : > { %382 = vst [vmem:[%s289_s20 + $0x70] sm:$0xff] %v381_v14  ;;  %384 = vst [vmem:[%s289_s20 + $0x78] sm:$0xff] %v383_v15 }
  0x3c PF: > { %390 = sbr.rel (!%p1820_p4) target bundleno = 78 (0x4e), region = 62  ;;  %s392_s18 = sand.u32 (%p1820_p4), 1, %s1671_s28  }
  0x3d   : > { %s1398_s19 = smul.u32 (%p1820_p4), 48, %s1687_s9  ;;  %s1324_s6 = sshll.u32 (%p1820_p4), %s392_s18, 7 }
  0x3e   : > { %s2383_s2 = sld [smem:[#allocation18_spill]] (%p1820_p4)  ;;  %s394_s17 = scalar_lea.vmem (%p1820_p4), [#allocation4], %s1324_s6 }
  0x3f   : > { %s397_s14 = sadd.s32 (%p1820_p4), %s1691_s10, %s1398_s19 }
  0x40   : > { %s1327_s5 = sshll.u32 (%p1820_p4), %s397_s14, 3 }
  0x44   : > { %s1886_s1 = scalar_lea.vmem %s2383_s2, %s1327_s5 }
  0x45   : > { %v458_v16 = vld [vmem:[%s1886_s1] sm:$0xff]  ;;  %v460_v17 = vld [vmem:[%s1886_s1 + $0x18] sm:$0xff]  ;;  %v462_v18 = vld [vmem:[%s1886_s1 + $0x30] sm:$0xff] }
  0x46   : > { %459 = vst [vmem:[%s394_s17] sm:$0xff] %v458_v16  ;;  %461 = vst [vmem:[%s394_s17 + $0x8] sm:$0xff] %v460_v17  ;;  %v464_v19 = vld [vmem:[%s1886_s1 + $0x48] sm:$0xff]  ;;  %v466_v20 = vld [vmem:[%s1886_s1 + $0x60] sm:$0xff] }
  0x47   : > { %463 = vst [vmem:[%s394_s17 + $0x10] sm:$0xff] %v462_v18  ;;  %v468_v21 = vld [vmem:[%s1886_s1 + $0x78] sm:$0xff]  ;;  %465 = vst [vmem:[%s394_s17 + $0x18] sm:$0xff] %v464_v19  ;;  %v470_v22 = vld [vmem:[%s1886_s1 + $0x90] sm:$0xff] }
  0x48   : > { %467 = vst [vmem:[%s394_s17 + $0x20] sm:$0xff] %v466_v20  ;;  %469 = vst [vmem:[%s394_s17 + $0x28] sm:$0xff] %v468_v21  ;;  %v472_v23 = vld [vmem:[%s1886_s1 + $0xa8] sm:$0xff]  ;;  %v474_v24 = vld [vmem:[%s1886_s1 + $0xc0] sm:$0xff] }
  0x49   : > { %471 = vst [vmem:[%s394_s17 + $0x30] sm:$0xff] %v470_v22  ;;  %473 = vst [vmem:[%s394_s17 + $0x38] sm:$0xff] %v472_v23  ;;  %v476_v25 = vld [vmem:[%s1886_s1 + $0xd8] sm:$0xff]  ;;  %v478_v26 = vld [vmem:[%s1886_s1 + $0xf0] sm:$0xff] }
  0x4a   : > { %475 = vst [vmem:[%s394_s17 + $0x40] sm:$0xff] %v474_v24  ;;  %v480_v27 = vld [vmem:[%s1886_s1 + $0x108] sm:$0xff]  ;;  %477 = vst [vmem:[%s394_s17 + $0x48] sm:$0xff] %v476_v25  ;;  %v482_v28 = vld [vmem:[%s1886_s1 + $0x120] sm:$0xff] }
  0x4b   : > { %479 = vst [vmem:[%s394_s17 + $0x50] sm:$0xff] %v478_v26  ;;  %481 = vst [vmem:[%s394_s17 + $0x58] sm:$0xff] %v480_v27  ;;  %v484_v29 = vld [vmem:[%s1886_s1 + $0x138] sm:$0xff]  ;;  %v486_v30 = vld [vmem:[%s1886_s1 + $0x150] sm:$0xff] }
  0x4c   : > { %483 = vst [vmem:[%s394_s17 + $0x60] sm:$0xff] %v482_v28  ;;  %485 = vst [vmem:[%s394_s17 + $0x68] sm:$0xff] %v484_v29  ;;  %v488_v31 = vld [vmem:[%s1886_s1 + $0x168] sm:$0xff] }
  0x4d   : > { %487 = vst [vmem:[%s394_s17 + $0x70] sm:$0xff] %v486_v30  ;;  %489 = vst [vmem:[%s394_s17 + $0x78] sm:$0xff] %v488_v31 }
  0x4e PF: > { %495 = sbr.rel (!%p1820_p4) target bundleno = 96 (0x60), region = 100  ;;  %s497_s20 = sand.u32 (%p1820_p4), 1, %s1671_s28  }
  0x4f   : > { %s1399_s18 = smul.u32 (%p1820_p4), 48, %s1687_s9  ;;  %s1328_s19 = sshll.u32 (%p1820_p4), %s497_s20, 7 }
  0x50   : > { %s2384_s3 = sld [smem:[#allocation19_spill]] (%p1820_p4)  ;;  %s499_s1 = scalar_lea.vmem (%p1820_p4), [#allocation5], %s1328_s19 }
  0x51   : > { %s502_s6 = sadd.s32 (%p1820_p4), %s1691_s10, %s1399_s18 }
  0x52   : > { %s1331_s14 = sshll.u32 (%p1820_p4), %s502_s6, 3 }
  0x56   : > { %s1912_s23 = scalar_lea.vmem %s2384_s3, %s1331_s14 }
  0x57   : > { %v563_v32 = vld [vmem:[%s1912_s23] sm:$0xff]  ;;  %v565_v33 = vld [vmem:[%s1912_s23 + $0x18] sm:$0xff]  ;;  %v567_v34 = vld [vmem:[%s1912_s23 + $0x30] sm:$0xff] }
  0x58   : > { %564 = vst [vmem:[%s499_s1] sm:$0xff] %v563_v32  ;;  %566 = vst [vmem:[%s499_s1 + $0x8] sm:$0xff] %v565_v33  ;;  %v569_v35 = vld [vmem:[%s1912_s23 + $0x48] sm:$0xff]  ;;  %v571_v36 = vld [vmem:[%s1912_s23 + $0x60] sm:$0xff] }
  0x59   : > { %568 = vst [vmem:[%s499_s1 + $0x10] sm:$0xff] %v567_v34  ;;  %v573_v37 = vld [vmem:[%s1912_s23 + $0x78] sm:$0xff]  ;;  %570 = vst [vmem:[%s499_s1 + $0x18] sm:$0xff] %v569_v35  ;;  %v575_v38 = vld [vmem:[%s1912_s23 + $0x90] sm:$0xff] }
  0x5a   : > { %572 = vst [vmem:[%s499_s1 + $0x20] sm:$0xff] %v571_v36  ;;  %574 = vst [vmem:[%s499_s1 + $0x28] sm:$0xff] %v573_v37  ;;  %v577_v39 = vld [vmem:[%s1912_s23 + $0xa8] sm:$0xff]  ;;  %v579_v40 = vld [vmem:[%s1912_s23 + $0xc0] sm:$0xff] }
  0x5b   : > { %576 = vst [vmem:[%s499_s1 + $0x30] sm:$0xff] %v575_v38  ;;  %578 = vst [vmem:[%s499_s1 + $0x38] sm:$0xff] %v577_v39  ;;  %v581_v41 = vld [vmem:[%s1912_s23 + $0xd8] sm:$0xff]  ;;  %v583_v42 = vld [vmem:[%s1912_s23 + $0xf0] sm:$0xff] }
  0x5c   : > { %580 = vst [vmem:[%s499_s1 + $0x40] sm:$0xff] %v579_v40  ;;  %v585_v43 = vld [vmem:[%s1912_s23 + $0x108] sm:$0xff]  ;;  %582 = vst [vmem:[%s499_s1 + $0x48] sm:$0xff] %v581_v41  ;;  %v587_v44 = vld [vmem:[%s1912_s23 + $0x120] sm:$0xff] }
  0x5d   : > { %584 = vst [vmem:[%s499_s1 + $0x50] sm:$0xff] %v583_v42  ;;  %586 = vst [vmem:[%s499_s1 + $0x58] sm:$0xff] %v585_v43  ;;  %v589_v45 = vld [vmem:[%s1912_s23 + $0x138] sm:$0xff]  ;;  %v591_v46 = vld [vmem:[%s1912_s23 + $0x150] sm:$0xff] }
  0x5e   : > { %588 = vst [vmem:[%s499_s1 + $0x60] sm:$0xff] %v587_v44  ;;  %590 = vst [vmem:[%s499_s1 + $0x68] sm:$0xff] %v589_v45  ;;  %v593_v47 = vld [vmem:[%s1912_s23 + $0x168] sm:$0xff] }
  0x5f   : > { %592 = vst [vmem:[%s499_s1 + $0x70] sm:$0xff] %v591_v46  ;;  %594 = vst [vmem:[%s499_s1 + $0x78] sm:$0xff] %v593_v47 }
  0x60 PF: > { %p1332_p1 = scmp.ge.s32.totalorder %s1699_s12, 1  ;;  %p617_p2 = scmp.lt.s32.totalorder %s1699_s12, 13 }
  0x62   : > { %p618_p3 = pnand %p1332_p1, %p617_p2 }
  0x63   : > { %s624_s21 = sand.u32 (!%p618_p3), 1, %s1667_s27   ;;  %s2361_s17 = sand.u32 (!%p618_p3), 1, %s1659_s25  }
  0x64   : > { %621 = sbr.rel (%p618_p3) target bundleno = 487 (0x1e7), region = 150  ;;  %s1333_s20 = sshll.u32 (!%p618_p3), %s624_s21, 7 }
  0x65   : > { %s1936_s18 = sshll.u32 (!%p618_p3), %s2361_s17, 3  ;;  %p694_p4 = scmp.lt.s32.totalorder (!%p618_p3), %s1683_s8, 1 }
  0x66   : > { %p696_p5 = scmp.lt.s32.totalorder (!%p618_p3), %s1675_s29, 1  ;;  %p705_p6 = scmp.lt.s32.totalorder (!%p618_p3), %s1679_s30, 2 }
  0x67   : > { %s2385_s0 = sld [smem:[#allocation16_spill]] (!%p618_p3)  ;;  %s1963_s23 = scalar_lea.vmem (!%p618_p3), [#allocation3], %s1333_s20 }
  0x68   : > { %s1967_s1 = scalar_lea.vmem (!%p618_p3), [#allocation5], %s1333_s20  ;;  %p1339_p7 = scmp.ne.s32.totalorder (!%p618_p3), %s1675_s29, 0 }
  0x69   : > { %s695_s19 = scalar_select %p694_p4, %s1683_s8, 1 }
  0x6a   : > { %s697_s6 = scalar_select %p696_p5, %s1675_s29, 1 }
  0x6b   : > { %s1337_s14 = sshll.u32 %s695_s19, 1  ;;  %s2386_s19 = sld [smem:[#allocation20_spill]] }
  0x6c   : > { %s699_s5 = sadd.s32 %s1337_s14, %s697_s6 }
  0x6d   : > { %s1338_s22 = sshll.u32 %s699_s5, 3  ;;  %s2387_s5 = sld [smem:[#allocation21_spill]] }
  0x6e   : > { %s1946_s2 = scalar_lea.vmem %s2385_s0, %s1338_s22  ;;  %s1965_s22 = scalar_lea.vmem [#allocation4], %s1333_s20 }
  0x6f   : > { %s1949_s27 = scalar_select %p705_p6, %s1679_s30, 2 }
  0x70   : > { %s693_s0 = scalar_lea.vmem [#allocation6], %s1936_s18  ;;  %717 = sbr.rel (%p1339_p7) target bundleno = 119 (0x77), region = 166 }
  0x71   : > { %s707_s3 = scalar_lea.vmem %s2353_s4, %s1949_s27  ;;  %s710_s9 = scalar_lea.vmem %s2386_s19, %s1949_s27 }
  0x73   : > { %s713_s7 = scalar_lea.vmem %s2387_s5, %s1949_s27 }
  0x75   : > { %v1701_v48 = vmov 0.0  }
  0x76   : > { %718 = vst [vmem:[#allocation2] sm:$0xff] %v1701_v48 }
  0x77 PF: > { %v1972_v49 = vld [vmem:[%s1965_s22 + $0x78] sm:$0xff]  ;;  %v1702_v50 = vmov 0.0   ;;  %v1977_v52 = vld [vmem:[%s1965_s22 + $0x70] sm:$0xff]  ;;  %vm1703_vm0 = vmmov 0   ;;  %v1982_v54 = vld [vmem:[%s1965_s22 + $0x68] sm:$0xff]  ;;  %p1340_p8 = scmp.ne.s32.totalorder %s1675_s29, 1 }
  0x78   : > { %1362 = vmatprep.subr.mxu0 %v1702_v50  ;;  %v782_v51 = vmin.f32 %v1972_v49, 20.0  ;;  %1394 = vmatprep.mubr.msk.f32.mxu0 %vm1703_vm0, %v1702_v50  ;;  %v781_v53 = vmin.f32 %v1977_v52, 20.0  ;;  %v780_v56 = vmin.f32 %v1982_v54, 20.0  ;;  %v1986_v57 = vld [vmem:[%s1965_s22 + $0x60] sm:$0xff]  ;;  %v1990_v61 = vld [vmem:[%s1965_s22 + $0x58] sm:$0xff]  ;;  %v1994_v0 = vld [vmem:[%s1965_s22 + $0x50] sm:$0xff] }
  0x79   : > { %v779_v59 = vmin.f32 %v1986_v57, 20.0  ;;  %v778_v63 = vmin.f32 %v1990_v61, 20.0  ;;  %v777_v1 = vmin.f32 %v1994_v0, 20.0  ;;  %v1998_v2 = vld [vmem:[%s1965_s22 + $0x48] sm:$0xff]  ;;  %v2002_v5 = vld [vmem:[%s1965_s22 + $0x40] sm:$0xff]  ;;  %v2006_v9 = vld [vmem:[%s1965_s22 + $0x38] sm:$0xff] }
  0x7a   : > { %v813_v55 = vmul.f32 1.442695, %v782_v51  ;;  %v811_v58 = vmul.f32 1.442695, %v781_v53  ;;  %v809_v60 = vmul.f32 1.442695, %v780_v56 }
  0x7b   : > { %v807_v62 = vmul.f32 1.442695, %v779_v59  ;;  %v805_v3 = vmul.f32 1.442695, %v778_v63  ;;  %v776_v4 = vmin.f32 %v1998_v2, 20.0  ;;  %v775_v7 = vmin.f32 %v2002_v5, 20.0 }
  0x7c   : > { %1507 = vpow2.f32 %v813_v55  ;;  %v803_v6 = vmul.f32 1.442695, %v777_v1  ;;  %v774_v11 = vmin.f32 %v2006_v9, 20.0  ;;  %v2010_v12 = vld [vmem:[%s1965_s22 + $0x30] sm:$0xff]  ;;  %v2014_v14 = vld [vmem:[%s1965_s22 + $0x28] sm:$0xff]  ;;  %v2018_v17 = vld [vmem:[%s1965_s22 + $0x20] sm:$0xff] }
  0x7d   : > { %1509 = vpow2.f32 %v811_v58  ;;  %v801_v8 = vmul.f32 1.442695, %v776_v4  ;;  %v799_v10 = vmul.f32 1.442695, %v775_v7  ;;  %v773_v13 = vmin.f32 %v2010_v12, 20.0  ;;  %v2021_v19 = vld [vmem:[%s1965_s22 + $0x18] sm:$0xff] }
  0x7e   : > { %1511 = vpow2.f32 %v809_v60  ;;  %v797_v15 = vmul.f32 1.442695, %v774_v11  ;;  %v772_v16 = vmin.f32 %v2014_v14, 20.0  ;;  %v771_v21 = vmin.f32 %v2018_v17, 20.0  ;;  %v2026_v24 = vld [vmem:[%s1965_s22 + $0x10] sm:$0xff]  ;;  %v2030_v35 = vld [vmem:[%s1965_s22 + $0x8] sm:$0xff] }
  0x7f   : > { %1513 = vpow2.f32 %v807_v62  ;;  %v795_v18 = vmul.f32 1.442695, %v773_v13  ;;  %v770_v23 = vmin.f32 %v2021_v19, 20.0  ;;  %v769_v34 = vmin.f32 %v2026_v24, 20.0 }
  0x80   : > { %1515 = vpow2.f32 %v805_v3  ;;  %v793_v20 = vmul.f32 1.442695, %v772_v16  ;;  %v791_v31 = vmul.f32 1.442695, %v771_v21  ;;  %v768_v46 = vmin.f32 %v2030_v35, 20.0 }
  0x81   : > { %1517 = vpow2.f32 %v803_v6  ;;  %v789_v38 = vmul.f32 1.442695, %v770_v23  ;;  %v2035_v53 = vmul.f32 1.442695, %v769_v34  ;;  %vm766_vm2 = vcmp.gt.f32.partialorder %v1972_v49, 20.0 }
  0x82   : > { %1519 = vpow2.f32 %v801_v8  ;;  %vm765_vm4 = vcmp.gt.f32.partialorder %v1977_v52, 20.0  ;;  %vm764_vm5 = vcmp.gt.f32.partialorder %v1982_v54, 20.0  ;;  %vm763_vm7 = vcmp.gt.f32.partialorder %v1986_v57, 20.0 }
  0x83   : > { %1521 = vpow2.f32 %v799_v10  ;;  %vm762_vm9 = vcmp.gt.f32.partialorder %v1990_v61, 20.0  ;;  %vm761_vm12 = vcmp.gt.f32.partialorder %v1994_v0, 20.0  ;;  %vm760_vm14 = vcmp.gt.f32.partialorder %v1998_v2, 20.0 }
  0x84   : > { %1523 = vpow2.f32 %v797_v15  ;;  %vm759_vm0 = vcmp.gt.f32.partialorder %v2002_v5, 20.0 }
  0x85   : > { %1525 = vpow2.f32 %v795_v18 }
  0x86   : > { %1527 = vpow2.f32 %v793_v20 }
  0x89   : > { %v1508_v22 = vpop.eup %1507 }
  0x8a   : > { %v1510_v25 = vpop.eup %1509  ;;  %v950_v26 = vadd.f32 1.0, %v1508_v22  ;;  %v953_v27 = vmul.f32 -0.5, %v1508_v22  ;;  %v956_v37 = vand.u32 2147483647, %v1508_v22 }
  0x8b   : > { %v1512_v28 = vpop.eup %1511  ;;  %v941_v29 = vadd.f32 1.0, %v1510_v25  ;;  %v944_v30 = vmul.f32 -0.5, %v1510_v25  ;;  %v947_v40 = vand.u32 2147483647, %v1510_v25 }
  0x8c   : > { %v1514_v32 = vpop.eup %1513  ;;  %1529 = vlog2.f32 %v950_v26  ;;  %v932_v33 = vadd.f32 1.0, %v1512_v28  ;;  %v954_v36 = vadd.f32 1.0, %v953_v27  ;;  %v935_v41 = vmul.f32 -0.5, %v1512_v28 }
  0x8d   : > { %1531 = vlog2.f32 %v941_v29  ;;  %v1516_v39 = vpop.eup %1515  ;;  %v923_v42 = vadd.f32 1.0, %v1514_v32  ;;  %v945_v44 = vadd.f32 1.0, %v944_v30  ;;  %v926_v45 = vmul.f32 -0.5, %v1514_v32 }
  0x8e   : > { %1533 = vlog2.f32 %v932_v33  ;;  %v1518_v43 = vpop.eup %1517  ;;  %v914_v48 = vadd.f32 1.0, %v1516_v39  ;;  %v917_v51 = vmul.f32 -0.5, %v1516_v39  ;;  %v2037_v55 = vmul.f32 %v1508_v22, %v954_v36 }
  0x8f   : > { %1535 = vpow2.f32 %v791_v31  ;;  %v2033_v47 = vpop.eup %1519  ;;  %vm2039_vm1 = vcmp.lt.f32.partialorder %v956_v37, 0.0004427343  ;;  %v938_v58 = vand.u32 2147483647, %v1512_v28  ;;  %vm2046_vm3 = vcmp.lt.f32.partialorder %v947_v40, 0.0004427343 }
  0x90   : > { %1537 = vlog2.f32 %v923_v42  ;;  %v2043_v59 = vpop.eup %1521  ;;  %v936_v62 = vadd.f32 1.0, %v935_v41  ;;  %v905_v63 = vadd.f32 1.0, %v1518_v43  ;;  %v908_v1 = vmul.f32 -0.5, %v1518_v43 }
  0x91   : > { %1539 = vpow2.f32 %v789_v38  ;;  %v2051_v3 = vmul.f32 %v1510_v25, %v945_v44  ;;  %v927_v4 = vadd.f32 1.0, %v926_v45  ;;  %v929_v6 = vand.u32 2147483647, %v1514_v32  ;;  %v2054_v8 = vpop.eup %1523 }
  0x92   : > { %1541 = vlog2.f32 %v914_v48  ;;  %v896_v7 = vadd.f32 1.0, %v2033_v47  ;;  %v918_v10 = vadd.f32 1.0, %v917_v51  ;;  %v920_v11 = vand.u32 2147483647, %v1516_v39  ;;  %v2063_v20 = vpop.eup %1525  ;;  %v990_v51 = vld [vmem:[%s1967_s1 + $0x78] sm:$0xff] }
  0x93   : > { %1543 = vlog2.f32 %v905_v63  ;;  %v899_v13 = vmul.f32 -0.5, %v2033_v47  ;;  %vm2058_vm6 = vcmp.lt.f32.partialorder %v938_v58, 0.0004427343  ;;  %v911_v16 = vand.u32 2147483647, %v1518_v43  ;;  %v2073_v30 = vpop.eup %1527 }
  0x94   : > { %1545 = vlog2.f32 %v896_v7  ;;  %v887_v18 = vadd.f32 1.0, %v2043_v59  ;;  %v937_v21 = vmul.f32 %v1512_v28, %v936_v62  ;;  %v909_v22 = vadd.f32 1.0, %v908_v1 }
  0x95   : > { %v902_v23 = vand.u32 2147483647, %v2033_v47  ;;  %v890_v25 = vmul.f32 -0.5, %v2043_v59  ;;  %vm2068_vm8 = vcmp.lt.f32.partialorder %v929_v6, 0.0004427343  ;;  %v900_v27 = vadd.f32 1.0, %v899_v13 }
  0x96   : > { %1547 = vlog2.f32 %v887_v18  ;;  %v878_v29 = vadd.f32 1.0, %v2054_v8  ;;  %v928_v31 = vmul.f32 %v1514_v32, %v927_v4  ;;  %v2076_v28 = vmul.f32 %v1516_v39, %v918_v10  ;;  %v989_v4 = vld [vmem:[%s1967_s1 + $0x70] sm:$0xff] }
  0x97   : > { %vm2078_vm10 = vcmp.lt.f32.partialorder %v920_v11, 0.0004427343  ;;  %v893_v34 = vand.u32 2147483647, %v2043_v59  ;;  %vm2083_vm11 = vcmp.lt.f32.partialorder %v911_v16, 0.0004427343  ;;  %v2090_v42 = vmul.f32 %v1518_v43, %v909_v22 }
  0x98   : > { %v891_v38 = vadd.f32 1.0, %v890_v25  ;;  %1549 = vlog2.f32 %v878_v29  ;;  %v881_v32 = vmul.f32 -0.5, %v2054_v8  ;;  %v869_v40 = vadd.f32 1.0, %v2063_v20  ;;  %v734_v11 = vld [vmem:[%s1963_s23 + $0x78] sm:$0xff]  ;;  %v733_v25 = vld [vmem:[%s1963_s23 + $0x70] sm:$0xff] }
  0x99   : > { %v1530_v36 = vpop.eup %1529  ;;  %vm2092_vm13 = vcmp.lt.f32.partialorder %v902_v23, 0.0004427343  ;;  %v884_v45 = vand.u32 2147483647, %v2054_v8  ;;  %v2100_v62 = vmul.f32 %v2033_v47, %v900_v27  ;;  %v872_v43 = vmul.f32 -0.5, %v2063_v20 }
  0x9a   : > { %v1532_v39 = vpop.eup %1531  ;;  %v952_v41 = vmul.f32 0.6931472, %v1530_v36  ;;  %1551 = vlog2.f32 %v869_v40  ;;  %vm2109_vm15 = vcmp.lt.f32.partialorder %v893_v34, 0.0004427343  ;;  %v860_v10 = vadd.f32 1.0, %v2073_v30  ;;  %v732_v34 = vld [vmem:[%s1963_s23 + $0x68] sm:$0xff] }
  0x9b   : > { %v1534_v48 = vpop.eup %1533  ;;  %v943_v58 = vmul.f32 0.6931472, %v1532_v39  ;;  %v2124_v16 = vmul.f32 %v2043_v59, %v891_v38  ;;  %v882_v18 = vadd.f32 1.0, %v881_v32  ;;  %v987_v38 = vld [vmem:[%s1967_s1 + $0x60] sm:$0xff] }
  0x9c   : > { %v2103_v63 = vpop.eup %1535  ;;  %v958_v1 = vsel %vm2039_vm1, %v2037_v55, %v952_v41  ;;  %v934_v6 = vmul.f32 0.6931472, %v1534_v48  ;;  %v988_v55 = vld [vmem:[%s1967_s1 + $0x68] sm:$0xff]  ;;  %vm2134_vm1 = vcmp.lt.f32.partialorder %v884_v45, 0.0004427343  ;;  %1553 = vlog2.f32 %v860_v10  ;;  %v731_v45 = vld [vmem:[%s1963_s23 + $0x60] sm:$0xff] }
  0x9d   : > { %v1538_v47 = vpop.eup %1537  ;;  %v974_v13 = vsel %vm766_vm2, %v1972_v49, %v958_v1  ;;  %v949_v56 = vsel %vm2046_vm3, %v2051_v3, %v943_v58  ;;  %vm758_vm2 = vcmp.gt.f32.partialorder %v2006_v9, 20.0  ;;  %v986_v48 = vld [vmem:[%s1967_s1 + $0x58] sm:$0xff]  ;;  %vm757_vm3 = vcmp.gt.f32.partialorder %v2010_v12, 20.0  ;;  %v985_v10 = vld [vmem:[%s1967_s1 + $0x50] sm:$0xff] }
  0x9e   : > { %v2126_v22 = vpop.eup %1539  ;;  %v1006_v23 = vmul.f32 %v990_v51, %v974_v13  ;;  %v973_v49 = vsel %vm765_vm4, %v1977_v52, %v949_v56  ;;  %v940_v60 = vsel %vm2058_vm6, %v937_v21, %v934_v6  ;;  %v925_v3 = vmul.f32 0.6931472, %v1538_v47 }
  0x9f   : > { %v1542_v59 = vpop.eup %1541  ;;  %v1005_v29 = vmul.f32 %v989_v4, %v973_v49  ;;  %v972_v36 = vsel %vm764_vm5, %v1982_v54, %v940_v60  ;;  %v873_v52 = vadd.f32 1.0, %v872_v43  ;;  %v875_v51 = vand.u32 2147483647, %v2063_v20 }
  0xa0   : > { %v1022_v15 = vadd.f32 %v1006_v23, %v734_v11  ;;  %v1004_v21 = vmul.f32 %v988_v55, %v972_v36  ;;  %v931_v32 = vsel %vm2068_vm8, %v928_v31, %v925_v3  ;;  %v916_v40 = vmul.f32 0.6931472, %v1542_v59  ;;  %v1544_v39 = vpop.eup %1543  ;;  %v984_v23 = vld [vmem:[%s1967_s1 + $0x48] sm:$0xff]  ;;  %v983_v3 = vld [vmem:[%s1967_s1 + $0x40] sm:$0xff] }
  0xa1   : > { %v1021_v41 = vadd.f32 %v1005_v29, %v733_v25  ;;  %v971_v54 = vsel %vm763_vm7, %v1986_v57, %v931_v32  ;;  %v863_v58 = vmul.f32 -0.5, %v2073_v30  ;;  %v1546_v43 = vpop.eup %1545  ;;  %v907_v4 = vmul.f32 0.6931472, %v1544_v39  ;;  %v730_v57 = vld [vmem:[%s1963_s23 + $0x58] sm:$0xff] }
  0xa2   : > { %1363 = vmatpush3.msra.mxu0 %v1022_v15  ;;  %v1020_v26 = vadd.f32 %v1004_v21, %v732_v34  ;;  %v1003_v31 = vmul.f32 %v987_v38, %v971_v54  ;;  %v922_v1 = vsel %vm2078_vm10, %v2076_v28, %v916_v40  ;;  %v898_v47 = vmul.f32 0.6931472, %v1546_v43  ;;  %v726_v54 = vld [vmem:[%s1963_s23 + $0x38] sm:$0xff] }
  0xa3   : > { %1364 = vmatprep.subr.mxu0 %v1702_v50  ;;  %v970_v6 = vsel %vm762_vm9, %v1990_v61, %v922_v1  ;;  %v883_v11 = vmul.f32 %v2054_v8, %v882_v18  ;;  %v851_v13 = vadd.f32 1.0, %v2103_v63  ;;  %v1548_v56 = vpop.eup %1547  ;;  %v913_v33 = vsel %vm2083_vm11, %v2090_v42, %v907_v4  ;;  %v729_v61 = vld [vmem:[%s1963_s23 + $0x50] sm:$0xff] }
  0xa4   : > { %1365 = vmatpush3.msra.mxu0 %v1021_v41  ;;  %v1019_v55 = vadd.f32 %v1003_v31, %v731_v45  ;;  %v1002_v28 = vmul.f32 %v986_v48, %v970_v6  ;;  %v874_v25 = vmul.f32 %v2063_v20, %v873_v52  ;;  %v969_v8 = vsel %vm761_vm12, %v1994_v0, %v913_v33  ;;  %v728_v0 = vld [vmem:[%s1963_s23 + $0x48] sm:$0xff]  ;;  %v982_v52 = vld [vmem:[%s1967_s1 + $0x38] sm:$0xff]  ;;  %v981_v45 = vld [vmem:[%s1967_s1 + $0x30] sm:$0xff] }
  0xa5   : > { %1366 = vmatprep.subr.mxu0 %v1702_v50  ;;  %v904_v18 = vsel %vm2092_vm13, %v2100_v62, %v898_v47  ;;  %v889_v49 = vmul.f32 0.6931472, %v1548_v56  ;;  %1555 = vlog2.f32 %v851_v13  ;;  %v1550_v60 = vpop.eup %1549  ;;  %v1001_v42 = vmul.f32 %v985_v10, %v969_v8  ;;  %v724_v56 = vld [vmem:[%s1963_s23 + $0x28] sm:$0xff] }
  0xa6   : > { %1367 = vmatpush3.msra.mxu0 %v1020_v26  ;;  %v1018_v37 = vadd.f32 %v1002_v28, %v730_v57  ;;  %v968_v20 = vsel %vm760_vm14, %v1998_v2, %v904_v18  ;;  %v864_v59 = vadd.f32 1.0, %v863_v58  ;;  %v880_v62 = vmul.f32 0.6931472, %v1550_v60  ;;  %v723_v60 = vld [vmem:[%s1963_s23 + $0x20] sm:$0xff] }
  0xa7   : > { %1368 = vmatprep.subr.mxu0 %v1702_v50  ;;  %v1000_v29 = vmul.f32 %v984_v23, %v968_v20  ;;  %v895_v44 = vsel %vm2109_vm15, %v2124_v16, %v889_v49  ;;  %v866_v34 = vand.u32 2147483647, %v2073_v30  ;;  %v1552_v36 = vpop.eup %1551  ;;  %v1017_v38 = vadd.f32 %v1001_v42, %v729_v61  ;;  %v727_v16 = vld [vmem:[%s1963_s23 + $0x40] sm:$0xff] }
  0xa8   : > { %1369 = vmatpush3.msra.mxu0 %v1019_v55  ;;  %v967_v2 = vsel %vm759_vm0, %v2002_v5, %v895_v44  ;;  %vm2192_vm4 = vcmp.lt.f32.partialorder %v875_v51, 0.0004427343  ;;  %v842_v7 = vadd.f32 1.0, %v2126_v22  ;;  %v886_v32 = vsel %vm2134_vm1, %v883_v11, %v880_v62  ;;  %v980_v11 = vld [vmem:[%s1967_s1 + $0x28] sm:$0xff]  ;;  %v979_v49 = vld [vmem:[%s1967_s1 + $0x20] sm:$0xff]  ;;  %v978_v44 = vld [vmem:[%s1967_s1 + $0x18] sm:$0xff] }
  0xa9   : > { %1370 = vmatprep.subr.mxu0 %v1702_v50  ;;  %v999_v21 = vmul.f32 %v983_v3, %v967_v2  ;;  %v871_v40 = vmul.f32 0.6931472, %v1552_v36  ;;  %v854_v39 = vmul.f32 -0.5, %v2103_v63  ;;  %v1016_v5 = vadd.f32 %v1000_v29, %v728_v0  ;;  %v1554_v43 = vpop.eup %1553 }
  0xaa   : > { %1371 = vmatpush3.msra.mxu0 %v1018_v37  ;;  %v966_v41 = vsel %vm758_vm2, %v2006_v9, %v886_v32  ;;  %vm756_vm5 = vcmp.gt.f32.partialorder %v2014_v14, 20.0  ;;  %1557 = vlog2.f32 %v842_v7  ;;  %v865_v51 = vmul.f32 %v2073_v30, %v864_v59  ;;  %v2217_v9 = vld [vmem:[%s1965_s22] sm:$0xff]  ;;  %v725_v30 = vld [vmem:[%s1963_s23 + $0x30] sm:$0xff] }
  0xab   : > { %1372 = vmatprep.subr.mxu0 %v1702_v50  ;;  %v998_v27 = vmul.f32 %v982_v52, %v966_v41  ;;  %v877_v48 = vsel %vm2192_vm4, %v874_v25, %v871_v40  ;;  %vm2212_vm6 = vcmp.lt.f32.partialorder %v866_v34, 0.0004427343  ;;  %v1015_v26 = vadd.f32 %v999_v21, %v727_v16 }
  0xac   : > { %1373 = vmatpush3.msra.mxu0 %v1017_v38  ;;  %v965_v31 = vsel %vm757_vm3, %v2010_v12, %v877_v48  ;;  %1559 = vpow2.f32 %v2035_v53  ;;  %v785_v1 = vmul.f32 1.442695, %v768_v46  ;;  %v862_v57 = vmul.f32 0.6931472, %v1554_v43  ;;  %v722_v38 = vld [vmem:[%s1963_s23 + $0x18] sm:$0xff]  ;;  %v977_v48 = vld [vmem:[%s1967_s1 + $0x10] sm:$0xff] }
  0xad   : > { %1374 = vmatprep.subr.mxu0 %v1702_v50  ;;  %v997_v4 = vmul.f32 %v981_v45, %v965_v31  ;;  %v855_v6 = vadd.f32 1.0, %v854_v39  ;;  %v857_v10 = vand.u32 2147483647, %v2103_v63  ;;  %v1014_v47 = vadd.f32 %v998_v27, %v726_v54  ;;  %v721_v31 = vld [vmem:[%s1963_s23 + $0x10] sm:$0xff] }
  0xae   : > { %1375 = vmatpush3.msra.mxu0 %v1016_v5  ;;  %v845_v13 = vmul.f32 -0.5, %v2126_v22  ;;  %1561 = vpow2.f32 %v785_v1  ;;  %v767_v12 = vmin.f32 %v2217_v9, 20.0  ;;  %v868_v46 = vsel %vm2212_vm6, %v865_v51, %v862_v57  ;;  %v976_v57 = vld [vmem:[%s1967_s1 + $0x8] sm:$0xff] }
  0xaf   : > { %1376 = vmatprep.subr.mxu0 %v1702_v50  ;;  %v1013_v53 = vadd.f32 %v997_v4, %v725_v30  ;;  %v964_v55 = vsel %vm756_vm5, %v2014_v14, %v868_v46  ;;  %v856_v23 = vmul.f32 %v2103_v63, %v855_v6  ;;  %vm858_vm7 = vcmp.lt.f32.partialorder %v857_v10, 0.0004427343 }
  0xb0   : > { %1377 = vmatpush3.msra.mxu0 %v1015_v26  ;;  %v783_v28 = vmul.f32 1.442695, %v767_v12  ;;  %v996_v33 = vmul.f32 %v980_v11, %v964_v55  ;;  %v846_v61 = vadd.f32 1.0, %v845_v13  ;;  %vm755_vm8 = vcmp.gt.f32.partialorder %v2018_v17, 20.0  ;;  %v720_v13 = vld [vmem:[%s1963_s23 + $0x8] sm:$0xff] }
  0xb1   : > { %1378 = vmatprep.subr.mxu0 %v1702_v50  ;;  %v848_v14 = vand.u32 2147483647, %v2126_v22  ;;  %vm754_vm10 = vcmp.gt.f32.partialorder %v2021_v19, 20.0  ;;  %vm753_vm12 = vcmp.gt.f32.partialorder %v2026_v24, 20.0  ;;  %vm752_vm14 = vcmp.gt.f32.partialorder %v2030_v35, 20.0 }
  0xb2   : > { %v1556_v25 = vpop.eup %1555  ;;  %1379 = vmatpush3.msra.mxu0 %v1014_v47  ;;  %1563 = vpow2.f32 %v783_v28  ;;  %v1012_v8 = vadd.f32 %v996_v33, %v724_v56  ;;  %v847_v42 = vmul.f32 %v2126_v22, %v846_v61  ;;  %vm751_vm0 = vcmp.gt.f32.partialorder %v2217_v9, 20.0  ;;  %v719_v28 = vld [vmem:[%s1963_s23] sm:$0xff]  ;;  %v1023_v61 = vld [vmem:[%s1946_s2] sm:$0xff] }
  0xb3   : > { %1380 = vmatprep.subr.mxu0 %v1702_v50  ;;  %v853_v18 = vmul.f32 0.6931472, %v1556_v25  ;;  %vm849_vm9 = vcmp.lt.f32.partialorder %v848_v14, 0.0004427343 }
  0xb4   : > { %1381 = vmatpush3.msra.mxu0 %v1013_v53 }
  0xb5   : > { %1382 = vmatprep.subr.mxu0 %v1702_v50  ;;  %v859_v63 = vsel %vm858_vm7, %v856_v23, %v853_v18 }
  0xb6   : > { %1383 = vmatpush3.msra.mxu0 %v1012_v8  ;;  %v963_v37 = vsel %vm755_vm8, %v2018_v17, %v859_v63 }
  0xb7   : > { %v1558_v20 = vpop.eup %1557  ;;  %1384 = vmatprep.subr.mxu0 %v1702_v50  ;;  %v995_v3 = vmul.f32 %v979_v49, %v963_v37 }
  0xb8   : > { %v844_v59 = vmul.f32 0.6931472, %v1558_v20 }
  0xb9   : > { %v1560_v0 = vpop.eup %1559  ;;  %v1011_v29 = vadd.f32 %v995_v3, %v723_v60 }
  0xba   : > { %v850_v62 = vsel %vm849_vm9, %v847_v42, %v844_v59  ;;  %v833_v34 = vadd.f32 1.0, %v1560_v0  ;;  %v836_v7 = vmul.f32 -0.5, %v1560_v0  ;;  %v839_v40 = vand.u32 2147483647, %v1560_v0 }
  0xbb   : > { %v1562_v36 = vpop.eup %1561  ;;  %1385 = vmatpush3.msra.mxu0 %v1011_v29  ;;  %v962_v17 = vsel %vm754_vm10, %v2021_v19, %v850_v62 }
  0xbc   : > { %1386 = vmatprep.subr.mxu0 %v1702_v50  ;;  %v994_v22 = vmul.f32 %v978_v44, %v962_v17  ;;  %1565 = vlog2.f32 %v833_v34  ;;  %v824_v2 = vadd.f32 1.0, %v1562_v36  ;;  %v827_v21 = vmul.f32 -0.5, %v1562_v36 }
  0xbd   : > { %v837_v32 = vadd.f32 1.0, %v836_v7  ;;  %v830_v41 = vand.u32 2147483647, %v1562_v36  ;;  %vm840_vm11 = vcmp.lt.f32.partialorder %v839_v40, 0.0004427343 }
  0xbe   : > { %v1010_v52 = vadd.f32 %v994_v22, %v722_v38  ;;  %1567 = vlog2.f32 %v824_v2  ;;  %v828_v39 = vadd.f32 1.0, %v827_v21 }
  0xbf   : > { %v1564_v15 = vpop.eup %1563  ;;  %v838_v5 = vmul.f32 %v1560_v0, %v837_v32  ;;  %vm831_vm13 = vcmp.lt.f32.partialorder %v830_v41, 0.0004427343 }
  0xc0   : > { %1387 = vmatpush3.msra.mxu0 %v1010_v52  ;;  %v815_v16 = vadd.f32 1.0, %v1564_v15  ;;  %v818_v19 = vmul.f32 -0.5, %v1564_v15  ;;  %v829_v51 = vmul.f32 %v1562_v36, %v828_v39  ;;  %v821_v58 = vand.u32 2147483647, %v1564_v15 }
  0xc1   : > { %1388 = vmatprep.subr.mxu0 %v1702_v50 }
  0xc2   : > { %1569 = vlog2.f32 %v815_v16  ;;  %v819_v27 = vadd.f32 1.0, %v818_v19  ;;  %vm822_vm15 = vcmp.lt.f32.partialorder %v821_v58, 0.0004427343 }
  0xc4   : > { %v820_v6 = vmul.f32 %v1564_v15, %v819_v27 }
  0xc9   : > { %v1566_v45 = vpop.eup %1565 }
  0xca   : > { %v835_v54 = vmul.f32 0.6931472, %v1566_v45 }
  0xcb   : > { %v1568_v43 = vpop.eup %1567 }
  0xcc   : > { %v841_v26 = vsel %vm840_vm11, %v838_v5, %v835_v54  ;;  %v826_v30 = vmul.f32 0.6931472, %v1568_v43 }
  0xcd   : > { %v961_v1 = vsel %vm753_vm12, %v2026_v24, %v841_v26  ;;  %v975_v24 = vld [vmem:[%s1967_s1] sm:$0xff] }
  0xce   : > { %v993_v4 = vmul.f32 %v977_v48, %v961_v1  ;;  %v832_v47 = vsel %vm831_vm13, %v829_v51, %v826_v30 }
  0xcf   : > { %v1570_v10 = vpop.eup %1569  ;;  %v960_v12 = vsel %vm752_vm14, %v2030_v35, %v832_v47  ;;  %v1024_v35 = vld [vmem:[#allocation2] sm:$0xff] }
  0xd0   : > { %v1009_v11 = vadd.f32 %v993_v4, %v721_v31  ;;  %v817_v46 = vmul.f32 0.6931472, %v1570_v10  ;;  %v992_v53 = vmul.f32 %v976_v57, %v960_v12 }
  0xd2   : > { %1389 = vmatpush3.msra.mxu0 %v1009_v11  ;;  %v823_v56 = vsel %vm822_vm15, %v820_v6, %v817_v46  ;;  %v1008_v55 = vadd.f32 %v992_v53, %v720_v13 }
  0xd3   : > { %1390 = vmatprep.subr.mxu0 %v1702_v50  ;;  %v959_v33 = vsel %vm751_vm0, %v2217_v9, %v823_v56 }
  0xd4   : > { %v991_v23 = vmul.f32 %v975_v24, %v959_v33  ;;  %1391 = vmatpush3.msra.mxu0 %v1008_v55 }
  0xd5   : > { %1392 = vmatprep.subr.mxu0 %v1702_v50 }
  0xd6   : > { %v1007_v25 = vadd.f32 %v991_v23, %v719_v28 }
  0xd8   : > { %1393 = vmatpush3.msra.mxu0 %v1007_v25 }
  0xd9   : > { %1395 = vmatmul.mubr.f32.vlgmr.msra.gmra.mxu0 %v1023_v61 }
 0x198   : > { %1100 = sbr.rel (%p1340_p8) target bundleno = 461 (0x1cd), region = 170 }
 0x199   : > { %v1091_v8 = vpop.f32.mrf.mxu0 }
 0x19a   : > { %v1095_v18 = vadd.f32 %v1091_v8, %v1024_v35 }
 0x19b   : > { %v1396_v14 = vpop.f32.mrf.mxu0 }
 0x19c   : > { %1096 = vst [vmem:[#allocation2] sm:$0xff] %v1095_v18 }
 0x19d   : > { %v1102_v9 = vld [vmem:[%s710_s9] sm:$0x1]  ;;  %v1122_v3 = vlaneseq }
 0x19e   : > { %v1104_v49 = vmin.f32 %v1102_v9, 20.0  ;;  %vm1103_vm2 = vcmp.gt.f32.partialorder %v1102_v9, 20.0  ;;  %v1117_v62 = vld [vmem:[%s713_s7] sm:$0x1] }
 0x19f   : > { %v1123_v44 = vshrl.u32 %v1122_v3, 7  ;;  %v1101_v36 = vld [vmem:[%s707_s3] sm:$0x1] }
 0x1a0   : > { %v1105_v50 = vmul.f32 1.442695, %v1104_v49 }
 0x1a1   : > { %v1124_v22 = vsub.s32 0, %v1123_v44 }
 0x1a2   : > { %1571 = vpow2.f32 %v1105_v50 }
 0x1a3   : > { %v1120_v52 = vld [vmem:[#allocation2] sm:$0xff] }
 0x1af   : > { %v1572_v63 = vpop.eup %1571 }
 0x1b0   : > { %v1107_v60 = vadd.f32 1.0, %v1572_v63  ;;  %v1110_v37 = vmul.f32 -0.5, %v1572_v63  ;;  %v1113_v20 = vand.u32 2147483647, %v1572_v63 }
 0x1b2   : > { %1573 = vlog2.f32 %v1107_v60  ;;  %v1111_v42 = vadd.f32 1.0, %v1110_v37  ;;  %vm1114_vm1 = vcmp.lt.f32.partialorder %v1113_v20, 0.0004427343 }
 0x1b4   : > { %v1112_v59 = vmul.f32 %v1572_v63, %v1111_v42 }
 0x1bf   : > { %v1574_v0 = vpop.eup %1573 }
 0x1c0   : > { %v1109_v29 = vmul.f32 0.6931472, %v1574_v0 }
 0x1c2   : > { %v1115_v34 = vsel %vm1114_vm1, %v1112_v59, %v1109_v29 }
 0x1c3   : > { %v1116_v38 = vsel %vm1103_vm2, %v1102_v9, %v1115_v34 }
 0x1c4   : > { %v1118_v17 = vmul.f32 %v1117_v62, %v1116_v38 }
 0x1c6   : > { %v1119_v2 = vadd.f32 %v1118_v17, %v1101_v36 }
 0x1c8   : > { %v1125_v15 = vrot.slane %v1119_v2, %v1124_v22 }
 0x1ca   : > { %v1127_v7 = vadd.f32 %v1125_v15, %v1120_v52 }
 0x1cc   : > { %1128 = vst [vmem:[%s693_s0] sm:$0xff] %v1127_v7 }
 0x1cd PF: > { %s1400_s7 = smul.u32 3, %s1683_s8  ;;  %s1145_s19 = sshll.u32 %s693_s0, 4  ;;  %s1146_s19 = int_to_ptr.vmem [resolvable:$true] %s1145_s19 }
 0x1ce   : > { %s2412_s5 = sld [smem:[#allocation22_spill]]  ;;  %s2413_s22 = sand.u32 1, %s1659_s25  }
 0x1cf   : > { %s1141_s27 = sadd.s32 %s1679_s30, %s1400_s7  ;;  %s1130_s1 = scalar_lea.sflag [#allocation7], %s2413_s22 }
 0x1d0   : > { %s1342_s3 = sshll.u32 %s1141_s27, 7  ;;  %s1575_s10 = scalar_lea.vmem %s1146_s19, 128 }
 0x1d1   : > { %p1576_p10 = scmp.ne.s32.totalorder %s1146_s19, %s1575_s10  ;;  %s1704_s11 = smov [#allocation6]  }
 0x1d2   : > { %s1579_s17 = sshll.u32 %s1704_s11, 4  ;;  %s1580_s17 = int_to_ptr.vmem [resolvable:$false] %s1579_s17 }
 0x1d3   : > { %p1577_p11 = pnand %p1576_p10, %p1831_p9  ;;  %s1581_s8 = scalar_lea.vmem %s1580_s17, 256 }
 0x1d4   : > { %s1143_s23 = scalar_lea.hbm %s2412_s5, %s1342_s3  ;;  %p1582_p0 = scmp.lt.s32.totalorder %s1146_s19, %s1580_s17 }
 0x1d5   : > { %p1578_p12 = pneg %p1577_p11  ;;  %p1583_p1 = scmp.lt.s32.totalorder %s1581_s8, %s1575_s10 }
 0x1d7   : > { %p1584_p2 = por %p1583_p1, %p1582_p0 }
 0x1d9   : > { %p1585_p3 = pnand %p1584_p2, %p1578_p12 }
 0x1db   : > { %1588 = shalt.err (!%p1585_p3)
}
 0x1dc   : > { %s1589_s0 = scalar_lea.hbm %s1143_s23, 128  ;;  %s1593_s2 = scalar_lea.hbm %s2412_s5, 768 }
 0x1dd   : > { %p1590_p4 = scmp.ne.s32.totalorder %s1143_s23, %s1589_s0  ;;  %p1594_p7 = scmp.lt.s32.totalorder %s1143_s23, %s2412_s5 }
 0x1de   : > { %p1595_p8 = scmp.lt.s32.totalorder %s1593_s2, %s1589_s0 }
 0x1df   : > { %p1591_p5 = pnand %p1590_p4, %p1831_p9 }
 0x1e0   : > { %p1596_p10 = por %p1595_p8, %p1594_p7 }
 0x1e1   : > { %p1592_p6 = pneg %p1591_p5 }
 0x1e3   : > { %p1597_p11 = pnand %p1596_p10, %p1592_p6 }
 0x1e5   : > { %1600 = shalt.err (!%p1597_p11)
}
 0x1e6   : > { %1401 = dma.vmem_to_hbm [thread:$0]  (%p1831_p9), %s1146_s19, 128, %s1143_s23, %s1130_s1  }
 0x1e7 PF: > { %p1407_p12 = scmp.ge.s32.totalorder %s1699_s12, 2  ;;  %s1157_s20 = sand.u32 1, %s1655_s24  }
 0x1e8   : > { %s1158_s21 = scalar_lea.sflag [#allocation7], %s1157_s20 }
 0x1e9   : > { %p1404_p0 = pnand %p1407_p12, %p1844_p13 }
 0x1eb   : > { %p1405_p1 = pneg %p1404_p0 }
 0x1ed   : > { %1650 = dma.done.wait (%p1405_p1), %s1158_s21, 128  }
 0x1ee   : > { %1652 = vsyncadd (%p1405_p1), %s1158_s21, 4294967168  ;;  %s20_s12 = sadd.s32 1, %s1699_s12   ;;  %s2414_s15 = sld [smem:[#allocation15_spill]] }
 0x1ef   : > { %p17_p2 = scmp.ge.s32.totalorder %s20_s12, 14   ;;  %s2415_s29 = sld [smem:[#allocation9_spill]] }
 0x1f0   : > { %s2416_s30 = sld [smem:[#allocation10_spill]]  ;;  %s2421_s24 = smov %s1659_s25 }
 0x1f1   : > { %s2417_s8 = sld [smem:[#allocation11_spill]]  ;;  %s2422_s25 = smov %s1663_s26 }
 0x1f2   : > { %s2418_s9 = sld [smem:[#allocation12_spill]]  ;;  %s2423_s26 = smov %s1849_s13 }
 0x1f3   : > { %s2419_s10 = sld [smem:[#allocation13_spill]]  ;;  %s2424_s27 = smov %s1671_s28 }
 0x1f4   : > { %s2420_s11 = sld [smem:[#allocation14_spill]]  ;;  %s2425_s28 = smov %s2414_s15 }
 0x1f5   :  { %19 = sbr.rel (!%p17_p2) target bundleno = 15 (0xf), region = 238 }
 0x1fa   :  { %1163 = vsyncpa [#allocation7], 1 }
 0x1fb   :  { %1165 = vsyncpa [#allocation7 + $0x1], 1 }

</bundles_post_ra>
